<compile_context>
chip_gen: v7x
topology: tpu7x:2x2x1
jax: 0.10.0
libtpu: 0.0.40
codegen_flags: <defaults>
</compile_context>

<pallas_src>
import jax
import jax.numpy as jnp
from jax.experimental import pallas as pl
from jax.experimental.pallas import tpu as pltpu


def _scale_conv1x1_kernel(w_ref, b_ref, x_ref, o_ref):
    # w_ref: SMEM (Cout, Cin)     scale-folded conv weights (scalars)
    # b_ref: SMEM (Cout,)         scale-folded bias (scalars)
    # x_ref: VMEM (Cin, ts, 128)  full (8,128)-aligned spatial slabs, one per channel
    # o_ref: VMEM (Cout, ts, 128)
    cout, cin = w_ref.shape
    for co in range(cout):  # tiny static unroll: Cout*Cin VPU FMAs on full slabs
        acc = x_ref[0].astype(jnp.float32) * w_ref[co, 0] + b_ref[co]
        for ci in range(1, cin):
            acc = acc + x_ref[ci].astype(jnp.float32) * w_ref[co, ci]
        # Direct, lane-dense, unmasked per-channel store (no concatenate / relayout).
        o_ref[co] = acc.astype(o_ref.dtype)


def scale_conv1x1(x_nchw, weight, bias, scale, *, ts=1024):
    """Forward of Scale(Conv2d(C, C, kernel_size=1), scale) on NCHW input."""
    N, C, H, W = x_nchw.shape
    Cout, Cin, kh, kw = weight.shape
    assert (kh, kw) == (1, 1) and Cin == C

    LANE = 128
    HW = H * W
    S = pl.cdiv(HW, LANE)  # number of 128-lane rows of the flattened spatial axis

    # Free view: contiguous NCHW is (N, C, H*W) -> (N, C, S, 128).  Only when HW is
    # not 128-aligned do we pay one minimal pad (not the case for typical image sizes,
    # and not in the demo below).
    x_flat = x_nchw.reshape(N, Cin, HW)
    padded = S * LANE != HW
    if padded:
        x_flat = jnp.pad(x_flat, ((0, 0), (0, 0), (0, S * LANE - HW)))
    x4 = x_flat.reshape(N, Cin, S, LANE)

    # Sublane tile: multiple of 8, or the full extent S (always legal).  Default sizes
    # each grid step at ~4 MiB of HBM traffic (in+out) for f32, C=4.
    ts = max(8, min(ts, S))
    ts = (ts // 8) * 8 if ts < S else S
    n_t = pl.cdiv(S, ts)  # ragged last block handled by Pallas, no host pad/crop

    # Fold the Scale buffer into the (tiny) conv parameters: y = (s*W) x + (s*b).
    s = jnp.asarray(scale, jnp.float32)
    w_s = weight.reshape(Cout, Cin).astype(jnp.float32) * s
    b_s = bias.astype(jnp.float32) * s

    # Double-buffered (Cin + Cout) x ts x 128 tiles in the input dtype, plus margin.
    # Clamp with headroom for v7x's 64 MiB physical VMEM (fine on v5e/v6e too).
    itemsize = jnp.dtype(x_nchw.dtype).itemsize
    tile_bytes = 2 * (Cin + Cout) * ts * LANE * itemsize
    vmem_bytes = min(48 * 1024 * 1024, max(16 * 1024 * 1024, tile_bytes + (2 << 20)))

    # TODO(synk): for large channel counts (C >= 128) switch to an MXU (jnp.dot) path;
    # for C=4 the scalar-folded VPU FMA is already below the HBM roofline everywhere.

    out4 = pl.pallas_call(
        _scale_conv1x1_kernel,
        out_shape=jax.ShapeDtypeStruct((N, Cout, S, LANE), x_nchw.dtype),
        grid=(N, n_t),
        in_specs=[
            pl.BlockSpec(memory_space=pltpu.MemorySpace.SMEM),  # folded weights
            pl.BlockSpec(memory_space=pltpu.MemorySpace.SMEM),  # folded bias
            pl.BlockSpec((None, Cin, ts, LANE), lambda n, t: (n, 0, t, 0)),
        ],
        out_specs=pl.BlockSpec((None, Cout, ts, LANE), lambda n, t: (n, 0, t, 0)),
        compiler_params=pltpu.CompilerParams(
            dimension_semantics=("parallel", "parallel"),
            vmem_limit_bytes=vmem_bytes,
        ),
    )(w_s, b_s, x4)

    out_flat = out4.reshape(N, Cout, S * LANE)
    if padded:
        out_flat = out_flat[:, :, :HW]
    return out_flat.reshape(N, Cout, H, W)


def _reference(x_nchw, weight, bias, scale):
    # Pure-JAX reference of Conv2d(1x1) * scale on NCHW.
    y = jnp.einsum("nchw,oc->nohw", x_nchw, weight[:, :, 0, 0]) + bias[None, :, None, None]
    return y * scale


if __name__ == "__main__":
    key = jax.random.PRNGKey(0)
    k1, k2, k3 = jax.random.split(key, 3)

    N, C, Hs, Ws = 2, 4, 16, 16  # batch=2, channels=4, spatial=16
    x = jax.random.normal(k1, (N, C, Hs, Ws), dtype=jnp.float32)
    # Deterministic "Conv2d(4, 4, 1)" parameters.
    weight = jax.random.normal(k2, (C, C, 1, 1), dtype=jnp.float32) * 0.1
    bias = jax.random.normal(k3, (C,), dtype=jnp.float32) * 0.1
    scale = 0.5  # the registered buffer in Scale.__init__

    out = scale_conv1x1(x, weight, bias, scale)
    out = jax.block_until_ready(out)

    ref = _reference(x, weight, bias, scale)
    assert out.shape == (N, C, Hs, Ws)
    assert jnp.allclose(out, ref, atol=1e-5, rtol=1e-5), "mismatch vs reference"

    print("KERNEL_OK")
</pallas_src>

<mosaic_0001>
module attributes {stable_mosaic.version = 11 : i64} {
  func.func @_scale_conv1x1_kernel(%arg0: i32, %arg1: i32, %arg2: memref<4x4xf32, #tpu.memory_space<smem>>, %arg3: memref<4xf32, #tpu.memory_space<smem>>, %arg4: memref<1x4x2x128xf32, #tpu.memory_space<vmem>>, %arg5: memref<1x4x2x128xf32, #tpu.memory_space<vmem>>) attributes {dimension_semantics = [#tpu.dimension_semantics<parallel>, #tpu.dimension_semantics<parallel>], iteration_bounds = array<i64: 2, 1>, scalar_prefetch = 0 : i64, scratch_operands = 0 : i64, tpu.core_type = #tpu.core_type<tc>, window_params = [{transform_indices = @transform_0, window_bounds = array<i64: 4, 4>}, {transform_indices = @transform_1, window_bounds = array<i64: 4>}, {transform_indices = @transform_2, window_bounds = array<i64: 1, 4, 2, 128>}, {transform_indices = @transform_3, window_bounds = array<i64: 1, 4, 2, 128>}]} {
    %c0 = arith.constant 0 : index
    %c0_0 = arith.constant 0 : index
    %c0_1 = arith.constant 0 : index
    %c0_2 = arith.constant 0 : index
    %0 = vector.load %arg4[%c0, %c0_0, %c0_1, %c0_2] : memref<1x4x2x128xf32, #tpu.memory_space<vmem>>, vector<1x1x2x128xf32>
    %1 = vector.shape_cast %0 : vector<1x1x2x128xf32> to vector<2x128xf32>
    %c0_3 = arith.constant 0 : index
    %c0_4 = arith.constant 0 : index
    %2 = memref.load %arg2[%c0_3, %c0_4] : memref<4x4xf32, #tpu.memory_space<smem>>
    %3 = vector.broadcast %2 : f32 to vector<2x128xf32>
    %4 = arith.mulf %1, %3 : vector<2x128xf32>
    %c0_5 = arith.constant 0 : index
    %5 = memref.load %arg3[%c0_5] : memref<4xf32, #tpu.memory_space<smem>>
    %6 = vector.broadcast %5 : f32 to vector<2x128xf32>
    %7 = arith.addf %4, %6 : vector<2x128xf32>
    %c0_6 = arith.constant 0 : index
    %c1 = arith.constant 1 : index
    %c0_7 = arith.constant 0 : index
    %c0_8 = arith.constant 0 : index
    %8 = vector.load %arg4[%c0_6, %c1, %c0_7, %c0_8] : memref<1x4x2x128xf32, #tpu.memory_space<vmem>>, vector<1x1x2x128xf32>
    %9 = vector.shape_cast %8 : vector<1x1x2x128xf32> to vector<2x128xf32>
    %c0_9 = arith.constant 0 : index
    %c1_10 = arith.constant 1 : index
    %10 = memref.load %arg2[%c0_9, %c1_10] : memref<4x4xf32, #tpu.memory_space<smem>>
    %11 = vector.broadcast %10 : f32 to vector<2x128xf32>
    %12 = arith.mulf %9, %11 : vector<2x128xf32>
    %13 = arith.addf %7, %12 : vector<2x128xf32>
    %c0_11 = arith.constant 0 : index
    %c2 = arith.constant 2 : index
    %c0_12 = arith.constant 0 : index
    %c0_13 = arith.constant 0 : index
    %14 = vector.load %arg4[%c0_11, %c2, %c0_12, %c0_13] : memref<1x4x2x128xf32, #tpu.memory_space<vmem>>, vector<1x1x2x128xf32>
    %15 = vector.shape_cast %14 : vector<1x1x2x128xf32> to vector<2x128xf32>
    %c0_14 = arith.constant 0 : index
    %c2_15 = arith.constant 2 : index
    %16 = memref.load %arg2[%c0_14, %c2_15] : memref<4x4xf32, #tpu.memory_space<smem>>
    %17 = vector.broadcast %16 : f32 to vector<2x128xf32>
    %18 = arith.mulf %15, %17 : vector<2x128xf32>
    %19 = arith.addf %13, %18 : vector<2x128xf32>
    %c0_16 = arith.constant 0 : index
    %c3 = arith.constant 3 : index
    %c0_17 = arith.constant 0 : index
    %c0_18 = arith.constant 0 : index
    %20 = vector.load %arg4[%c0_16, %c3, %c0_17, %c0_18] : memref<1x4x2x128xf32, #tpu.memory_space<vmem>>, vector<1x1x2x128xf32>
    %21 = vector.shape_cast %20 : vector<1x1x2x128xf32> to vector<2x128xf32>
    %c0_19 = arith.constant 0 : index
    %c3_20 = arith.constant 3 : index
    %22 = memref.load %arg2[%c0_19, %c3_20] : memref<4x4xf32, #tpu.memory_space<smem>>
    %23 = vector.broadcast %22 : f32 to vector<2x128xf32>
    %24 = arith.mulf %21, %23 : vector<2x128xf32>
    %25 = arith.addf %19, %24 : vector<2x128xf32>
    %c0_21 = arith.constant 0 : index
    %c0_22 = arith.constant 0 : index
    %c0_23 = arith.constant 0 : index
    %c0_24 = arith.constant 0 : index
    %26 = vector.load %arg5[%c0_21, %c0_22, %c0_23, %c0_24] : memref<1x4x2x128xf32, #tpu.memory_space<vmem>>, vector<1x1x2x128xf32>
    %27 = vector.shape_cast %26 : vector<1x1x2x128xf32> to vector<2x128xf32>
    %28 = vector.shape_cast %25 : vector<2x128xf32> to vector<1x1x2x128xf32>
    tpu.vector_store %arg5[%c0_21, %c0_22, %c0_23, %c0_24], %28 {strides = array<i32>} : memref<1x4x2x128xf32, #tpu.memory_space<vmem>>, vector<1x1x2x128xf32>,
    %c0_25 = arith.constant 0 : index
    %c0_26 = arith.constant 0 : index
    %c0_27 = arith.constant 0 : index
    %c0_28 = arith.constant 0 : index
    %29 = vector.load %arg4[%c0_25, %c0_26, %c0_27, %c0_28] : memref<1x4x2x128xf32, #tpu.memory_space<vmem>>, vector<1x1x2x128xf32>
    %30 = vector.shape_cast %29 : vector<1x1x2x128xf32> to vector<2x128xf32>
    %c1_29 = arith.constant 1 : index
    %c0_30 = arith.constant 0 : index
    %31 = memref.load %arg2[%c1_29, %c0_30] : memref<4x4xf32, #tpu.memory_space<smem>>
    %32 = vector.broadcast %31 : f32 to vector<2x128xf32>
    %33 = arith.mulf %30, %32 : vector<2x128xf32>
    %c1_31 = arith.constant 1 : index
    %34 = memref.load %arg3[%c1_31] : memref<4xf32, #tpu.memory_space<smem>>
    %35 = vector.broadcast %34 : f32 to vector<2x128xf32>
    %36 = arith.addf %33, %35 : vector<2x128xf32>
    %c0_32 = arith.constant 0 : index
    %c1_33 = arith.constant 1 : index
    %c0_34 = arith.constant 0 : index
    %c0_35 = arith.constant 0 : index
    %37 = vector.load %arg4[%c0_32, %c1_33, %c0_34, %c0_35] : memref<1x4x2x128xf32, #tpu.memory_space<vmem>>, vector<1x1x2x128xf32>
    %38 = vector.shape_cast %37 : vector<1x1x2x128xf32> to vector<2x128xf32>
    %c1_36 = arith.constant 1 : index
    %c1_37 = arith.constant 1 : index
    %39 = memref.load %arg2[%c1_36, %c1_37] : memref<4x4xf32, #tpu.memory_space<smem>>
    %40 = vector.broadcast %39 : f32 to vector<2x128xf32>
    %41 = arith.mulf %38, %40 : vector<2x128xf32>
    %42 = arith.addf %36, %41 : vector<2x128xf32>
    %c0_38 = arith.constant 0 : index
    %c2_39 = arith.constant 2 : index
    %c0_40 = arith.constant 0 : index
    %c0_41 = arith.constant 0 : index
    %43 = vector.load %arg4[%c0_38, %c2_39, %c0_40, %c0_41] : memref<1x4x2x128xf32, #tpu.memory_space<vmem>>, vector<1x1x2x128xf32>
    %44 = vector.shape_cast %43 : vector<1x1x2x128xf32> to vector<2x128xf32>
    %c1_42 = arith.constant 1 : index
    %c2_43 = arith.constant 2 : index
    %45 = memref.load %arg2[%c1_42, %c2_43] : memref<4x4xf32, #tpu.memory_space<smem>>
    %46 = vector.broadcast %45 : f32 to vector<2x128xf32>
    %47 = arith.mulf %44, %46 : vector<2x128xf32>
    %48 = arith.addf %42, %47 : vector<2x128xf32>
    %c0_44 = arith.constant 0 : index
    %c3_45 = arith.constant 3 : index
    %c0_46 = arith.constant 0 : index
    %c0_47 = arith.constant 0 : index
    %49 = vector.load %arg4[%c0_44, %c3_45, %c0_46, %c0_47] : memref<1x4x2x128xf32, #tpu.memory_space<vmem>>, vector<1x1x2x128xf32>
    %50 = vector.shape_cast %49 : vector<1x1x2x128xf32> to vector<2x128xf32>
    %c1_48 = arith.constant 1 : index
    %c3_49 = arith.constant 3 : index
    %51 = memref.load %arg2[%c1_48, %c3_49] : memref<4x4xf32, #tpu.memory_space<smem>>
    %52 = vector.broadcast %51 : f32 to vector<2x128xf32>
    %53 = arith.mulf %50, %52 : vector<2x128xf32>
    %54 = arith.addf %48, %53 : vector<2x128xf32>
    %c0_50 = arith.constant 0 : index
    %c1_51 = arith.constant 1 : index
    %c0_52 = arith.constant 0 : index
    %c0_53 = arith.constant 0 : index
    %55 = vector.load %arg5[%c0_50, %c1_51, %c0_52, %c0_53] : memref<1x4x2x128xf32, #tpu.memory_space<vmem>>, vector<1x1x2x128xf32>
    %56 = vector.shape_cast %55 : vector<1x1x2x128xf32> to vector<2x128xf32>
    %57 = vector.shape_cast %54 : vector<2x128xf32> to vector<1x1x2x128xf32>
    tpu.vector_store %arg5[%c0_50, %c1_51, %c0_52, %c0_53], %57 {strides = array<i32>} : memref<1x4x2x128xf32, #tpu.memory_space<vmem>>, vector<1x1x2x128xf32>,
    %c0_54 = arith.constant 0 : index
    %c0_55 = arith.constant 0 : index
    %c0_56 = arith.constant 0 : index
    %c0_57 = arith.constant 0 : index
    %58 = vector.load %arg4[%c0_54, %c0_55, %c0_56, %c0_57] : memref<1x4x2x128xf32, #tpu.memory_space<vmem>>, vector<1x1x2x128xf32>
    %59 = vector.shape_cast %58 : vector<1x1x2x128xf32> to vector<2x128xf32>
    %c2_58 = arith.constant 2 : index
    %c0_59 = arith.constant 0 : index
    %60 = memref.load %arg2[%c2_58, %c0_59] : memref<4x4xf32, #tpu.memory_space<smem>>
    %61 = vector.broadcast %60 : f32 to vector<2x128xf32>
    %62 = arith.mulf %59, %61 : vector<2x128xf32>
    %c2_60 = arith.constant 2 : index
    %63 = memref.load %arg3[%c2_60] : memref<4xf32, #tpu.memory_space<smem>>
    %64 = vector.broadcast %63 : f32 to vector<2x128xf32>
    %65 = arith.addf %62, %64 : vector<2x128xf32>
    %c0_61 = arith.constant 0 : index
    %c1_62 = arith.constant 1 : index
    %c0_63 = arith.constant 0 : index
    %c0_64 = arith.constant 0 : index
    %66 = vector.load %arg4[%c0_61, %c1_62, %c0_63, %c0_64] : memref<1x4x2x128xf32, #tpu.memory_space<vmem>>, vector<1x1x2x128xf32>
    %67 = vector.shape_cast %66 : vector<1x1x2x128xf32> to vector<2x128xf32>
    %c2_65 = arith.constant 2 : index
    %c1_66 = arith.constant 1 : index
    %68 = memref.load %arg2[%c2_65, %c1_66] : memref<4x4xf32, #tpu.memory_space<smem>>
    %69 = vector.broadcast %68 : f32 to vector<2x128xf32>
    %70 = arith.mulf %67, %69 : vector<2x128xf32>
    %71 = arith.addf %65, %70 : vector<2x128xf32>
    %c0_67 = arith.constant 0 : index
    %c2_68 = arith.constant 2 : index
    %c0_69 = arith.constant 0 : index
    %c0_70 = arith.constant 0 : index
    %72 = vector.load %arg4[%c0_67, %c2_68, %c0_69, %c0_70] : memref<1x4x2x128xf32, #tpu.memory_space<vmem>>, vector<1x1x2x128xf32>
    %73 = vector.shape_cast %72 : vector<1x1x2x128xf32> to vector<2x128xf32>
    %c2_71 = arith.constant 2 : index
    %c2_72 = arith.constant 2 : index
    %74 = memref.load %arg2[%c2_71, %c2_72] : memref<4x4xf32, #tpu.memory_space<smem>>
    %75 = vector.broadcast %74 : f32 to vector<2x128xf32>
    %76 = arith.mulf %73, %75 : vector<2x128xf32>
    %77 = arith.addf %71, %76 : vector<2x128xf32>
    %c0_73 = arith.constant 0 : index
    %c3_74 = arith.constant 3 : index
    %c0_75 = arith.constant 0 : index
    %c0_76 = arith.constant 0 : index
    %78 = vector.load %arg4[%c0_73, %c3_74, %c0_75, %c0_76] : memref<1x4x2x128xf32, #tpu.memory_space<vmem>>, vector<1x1x2x128xf32>
    %79 = vector.shape_cast %78 : vector<1x1x2x128xf32> to vector<2x128xf32>
    %c2_77 = arith.constant 2 : index
    %c3_78 = arith.constant 3 : index
    %80 = memref.load %arg2[%c2_77, %c3_78] : memref<4x4xf32, #tpu.memory_space<smem>>
    %81 = vector.broadcast %80 : f32 to vector<2x128xf32>
    %82 = arith.mulf %79, %81 : vector<2x128xf32>
    %83 = arith.addf %77, %82 : vector<2x128xf32>
    %c0_79 = arith.constant 0 : index
    %c2_80 = arith.constant 2 : index
    %c0_81 = arith.constant 0 : index
    %c0_82 = arith.constant 0 : index
    %84 = vector.load %arg5[%c0_79, %c2_80, %c0_81, %c0_82] : memref<1x4x2x128xf32, #tpu.memory_space<vmem>>, vector<1x1x2x128xf32>
    %85 = vector.shape_cast %84 : vector<1x1x2x128xf32> to vector<2x128xf32>
    %86 = vector.shape_cast %83 : vector<2x128xf32> to vector<1x1x2x128xf32>
    tpu.vector_store %arg5[%c0_79, %c2_80, %c0_81, %c0_82], %86 {strides = array<i32>} : memref<1x4x2x128xf32, #tpu.memory_space<vmem>>, vector<1x1x2x128xf32>,
    %c0_83 = arith.constant 0 : index
    %c0_84 = arith.constant 0 : index
    %c0_85 = arith.constant 0 : index
    %c0_86 = arith.constant 0 : index
    %87 = vector.load %arg4[%c0_83, %c0_84, %c0_85, %c0_86] : memref<1x4x2x128xf32, #tpu.memory_space<vmem>>, vector<1x1x2x128xf32>
    %88 = vector.shape_cast %87 : vector<1x1x2x128xf32> to vector<2x128xf32>
    %c3_87 = arith.constant 3 : index
    %c0_88 = arith.constant 0 : index
    %89 = memref.load %arg2[%c3_87, %c0_88] : memref<4x4xf32, #tpu.memory_space<smem>>
    %90 = vector.broadcast %89 : f32 to vector<2x128xf32>
    %91 = arith.mulf %88, %90 : vector<2x128xf32>
    %c3_89 = arith.constant 3 : index
    %92 = memref.load %arg3[%c3_89] : memref<4xf32, #tpu.memory_space<smem>>
    %93 = vector.broadcast %92 : f32 to vector<2x128xf32>
    %94 = arith.addf %91, %93 : vector<2x128xf32>
    %c0_90 = arith.constant 0 : index
    %c1_91 = arith.constant 1 : index
    %c0_92 = arith.constant 0 : index
    %c0_93 = arith.constant 0 : index
    %95 = vector.load %arg4[%c0_90, %c1_91, %c0_92, %c0_93] : memref<1x4x2x128xf32, #tpu.memory_space<vmem>>, vector<1x1x2x128xf32>
    %96 = vector.shape_cast %95 : vector<1x1x2x128xf32> to vector<2x128xf32>
    %c3_94 = arith.constant 3 : index
    %c1_95 = arith.constant 1 : index
    %97 = memref.load %arg2[%c3_94, %c1_95] : memref<4x4xf32, #tpu.memory_space<smem>>
    %98 = vector.broadcast %97 : f32 to vector<2x128xf32>
    %99 = arith.mulf %96, %98 : vector<2x128xf32>
    %100 = arith.addf %94, %99 : vector<2x128xf32>
    %c0_96 = arith.constant 0 : index
    %c2_97 = arith.constant 2 : index
    %c0_98 = arith.constant 0 : index
    %c0_99 = arith.constant 0 : index
    %101 = vector.load %arg4[%c0_96, %c2_97, %c0_98, %c0_99] : memref<1x4x2x128xf32, #tpu.memory_space<vmem>>, vector<1x1x2x128xf32>
    %102 = vector.shape_cast %101 : vector<1x1x2x128xf32> to vector<2x128xf32>
    %c3_100 = arith.constant 3 : index
    %c2_101 = arith.constant 2 : index
    %103 = memref.load %arg2[%c3_100, %c2_101] : memref<4x4xf32, #tpu.memory_space<smem>>
    %104 = vector.broadcast %103 : f32 to vector<2x128xf32>
    %105 = arith.mulf %102, %104 : vector<2x128xf32>
    %106 = arith.addf %100, %105 : vector<2x128xf32>
    %c0_102 = arith.constant 0 : index
    %c3_103 = arith.constant 3 : index
    %c0_104 = arith.constant 0 : index
    %c0_105 = arith.constant 0 : index
    %107 = vector.load %arg4[%c0_102, %c3_103, %c0_104, %c0_105] : memref<1x4x2x128xf32, #tpu.memory_space<vmem>>, vector<1x1x2x128xf32>
    %108 = vector.shape_cast %107 : vector<1x1x2x128xf32> to vector<2x128xf32>
    %c3_106 = arith.constant 3 : index
    %c3_107 = arith.constant 3 : index
    %109 = memref.load %arg2[%c3_106, %c3_107] : memref<4x4xf32, #tpu.memory_space<smem>>
    %110 = vector.broadcast %109 : f32 to vector<2x128xf32>
    %111 = arith.mulf %108, %110 : vector<2x128xf32>
    %112 = arith.addf %106, %111 : vector<2x128xf32>
    %c0_108 = arith.constant 0 : index
    %c3_109 = arith.constant 3 : index
    %c0_110 = arith.constant 0 : index
    %c0_111 = arith.constant 0 : index
    %113 = vector.load %arg5[%c0_108, %c3_109, %c0_110, %c0_111] : memref<1x4x2x128xf32, #tpu.memory_space<vmem>>, vector<1x1x2x128xf32>
    %114 = vector.shape_cast %113 : vector<1x1x2x128xf32> to vector<2x128xf32>
    %115 = vector.shape_cast %112 : vector<2x128xf32> to vector<1x1x2x128xf32>
    tpu.vector_store %arg5[%c0_108, %c3_109, %c0_110, %c0_111], %115 {strides = array<i32>} : memref<1x4x2x128xf32, #tpu.memory_space<vmem>>, vector<1x1x2x128xf32>,
    return
  }
  func.func @transform_0(%arg0: i32, %arg1: i32) -> (i32, i32) {
    %c0_i32 = arith.constant 0 : i32
    %c0_i32_0 = arith.constant 0 : i32
    %c0_i32_1 = arith.constant 0 : i32
    return %c0_i32, %c0_i32_0 : i32, i32
  }
  func.func @transform_1(%arg0: i32, %arg1: i32) -> i32 {
    %c0_i32 = arith.constant 0 : i32
    %c0_i32_0 = arith.constant 0 : i32
    return %c0_i32 : i32
  }
  func.func @transform_2(%arg0: i32, %arg1: i32) -> (i32, i32, i32, i32) {
    %c0_i32 = arith.constant 0 : i32
    %c0_i32_0 = arith.constant 0 : i32
    %c0_i32_1 = arith.constant 0 : i32
    return %arg0, %c0_i32, %arg1, %c0_i32_0 : i32, i32, i32, i32
  }
  func.func @transform_3(%arg0: i32, %arg1: i32) -> (i32, i32, i32, i32) {
    %c0_i32 = arith.constant 0 : i32
    %c0_i32_0 = arith.constant 0 : i32
    %c0_i32_1 = arith.constant 0 : i32
    return %arg0, %c0_i32, %arg1, %c0_i32_0 : i32, i32, i32, i32
  }
}

</mosaic_0001>

<bundles_post_ra>
// kernel: tpu_custom_call.1
= control target key start
LH: loop header
LB: loop body
LE: loop exit
PB: predicated region body
PF: predicated region fallthrough
CT: control target
= control target key end

     0   :  { %8 = vsyncpa [#allocation5], 0  ;;  %s1068_s0 = inlined_call_operand.hbm [shape: f32[4,4], index: 0, kind: input, shape index: {}]   ;;  %s1069_s1 = inlined_call_operand.vmem [shape: f32[4], index: 1, kind: input, shape index: {}]   ;;  %s1070_s2 = inlined_call_operand.hbm [shape: f32[2,4,2,128], index: 2, kind: input, shape index: {}]   ;;  %s1071_s3 = inlined_call_operand.hbm [shape: f32[2,4,2,128], index: 3, kind: output, shape index: {}]  }
   0x1   :  { %9 = vsyncpa [#allocation6], 0 }
   0x2   :  { %10 = vsyncpa [#allocation3], 0 }
   0x3   :  { %12 = vsyncpa [#allocation3 + $0x1], 0 }
   0x4   :  { %13 = vsyncpa [#allocation4], 0 }
   0x5   :  { %15 = vsyncpa [#allocation4 + $0x1], 0  ;;  %s772_s12 = smov 0   ;;  %s774_s13 = smov 0  }
   0x6   :  { %s776_s14 = smov 0   ;;  %s778_s15 = smov 0  }
   0x7   :  { %s780_s16 = smov 0   ;;  %s782_s17 = smov 0  }
   0x8 LB: > { %s453_s18 = sadd.s32 4294967295, %s742_s17   ;;  %s454_s19 = sadd.s32 4294967294, %s742_s17   ;;  %s742_s17 = sphi %s782_s17, %s21_s17   ;;  %s738_s16 = sphi %s780_s16, %s1092_s16   ;;  %s734_s15 = sphi %s778_s15, %s1091_s15   ;;  %s730_s14 = sphi %s776_s14, %s1090_s14   ;;  %s726_s13 = sphi %s774_s13, %s1089_s13   ;;  %s722_s12 = sphi %s772_s12, %s1088_s12  }
   0x9   : > { %s84_s20 = sadd.s32 1, %s730_s14  ;;  %p91_p0 = scmp.ne.s32.totalorder %s730_s14, %s726_s13 }
   0xa   : > { %p92_p1 = scmp.eq.s32.totalorder %s742_s17, 0  ;;  %p97_p2 = scmp.ne.s32.totalorder %s726_s13, %s722_s12 }
   0xb   : > { %p810_p3 = scmp.eq.s32.totalorder %s453_s18, 0  ;;  %p123_p4 = scmp.eq.s32.totalorder %s453_s18, 1 }
   0xc   : > { %p93_p5 = por %p92_p1, %p91_p0  ;;  %p129_p6 = scmp.eq.s32.totalorder %s454_s19, 1 }
   0xd   : > { %s1076_s21 = scalar_select %p810_p3, 1, 0 }
   0xe   : > { %p816_p7 = por %p810_p3, %p97_p2  ;;  %p820_p8 = por %p123_p4, %p91_p0 }
   0xf   : > { %p824_p9 = por %p129_p6, %p97_p2  ;;  %p455_p10 = scmp.ge.s32.totalorder %s742_s17, 1 }
  0x10   : > { %s1077_s22 = scalar_select %p816_p7, 1, 0 }
  0x11   : > { %s1078_s23 = scalar_select %p820_p8, 1, 0 }
  0x12   : > { %s1079_s24 = scalar_select %p824_p9, 1, 0 }
  0x13   : > { %p136_p11 = scmp.lt.s32.totalorder %s742_s17, 3  ;;  %p536_p1 = scmp.lt.s32.totalorder %s742_s17, 2 }
  0x14   : > { %s158_s28 = sshll.u32 %s1069_s1, 4  ;;  %s169_s4 = sand.u32 1, %s730_s14   ;;  %s159_s28 = int_to_ptr.vmem [resolvable:$true] %s158_s28 }
  0x15   : > { %p831_p13 = pnand %p455_p10, %p136_p11  ;;  %p841_p4 = pnand %p536_p1, %p93_p5 }
  0x16   : > { %s33_s5 = sadd.s32 1, %s738_s16  ;;  %s594_s8 = scalar_lea.hbm %s1068_s0, 64 }
  0x17   : > { %p519_p0 = pneg %p831_p13  ;;  %p595_p5 = scmp.ne.s32.totalorder %s1068_s0, %s594_s8 }
  0x18   : > { %p601_p1 = scmp.lt.u32.totalorder %s594_s8, %s1068_s0 }
  0x19   : > { %p847_p2 = pnand %p519_p0, %p810_p3 }
  0x1b   : > { %p596_p6 = pneg %p847_p2 }
  0x1d   : > { %p597_p10 = pnand %p596_p6, %p595_p5 }
  0x1f   : > { %p598_p11 = pneg %p597_p10 }
  0x21   : > { %p603_p0 = pnand %p601_p1, %p598_p11 }
  0x23   : > { %606 = shalt.err (!%p603_p0)
}
  0x24   : > { %s744_s19 = smov [#allocation2]   ;;  %s607_s6 = scalar_lea.vmem %s159_s28, 16 }
  0x25   : > { %522 = dma.hbm_to_smem (!%p847_p2), %s1068_s0, 64, %s744_s19, [#allocation5]  }
  0x26   : > { %p608_p12 = scmp.ne.s32.totalorder %s159_s28, %s607_s6  ;;  %p615_p7 = scmp.lt.s32.totalorder %s159_s28, %s159_s28 }
  0x27   : > { %p616_p5 = scmp.lt.s32.totalorder %s607_s6, %s607_s6 }
  0x28   : > { %p610_p9 = pnand %p608_p12, %p596_p6 }
  0x29   : > { %p617_p10 = por %p616_p5, %p615_p7 }
  0x2a   : > { %p611_p8 = pneg %p610_p9 }
  0x2c   : > { %p618_p3 = pnand %p617_p10, %p611_p8 }
  0x2e   : > { %621 = shalt.err (!%p618_p3)
}
  0x2f   : > { %s745_s7 = smov [#allocation7]   ;;  %p35_p11 = scmp.ge.s32.totalorder %s33_s5, 2 }
  0x30   : > { %525 = dma.vmem_to_smem (!%p847_p2), %s159_s28, 16, %s745_s7, [#allocation6]  }
  0x31   : > { %s459_s8 = sshll.u32 %s169_s4, 3  ;;  %s505_s9 = sshll.u32 %s738_s16, 7 }
  0x32   : > { %s1094_s5 = smov (%p35_p11, %s33_s5), 0  ;;  %s879_s30 = scalar_lea.hbm %s1070_s2, %s505_s9 }
  0x33   : > { %s79_s18 = ssub.s32 %s738_s16, %s1094_s5  ;;  %s173_s19 = scalar_lea.vmem [#allocation8], %s459_s8 }
  0x34   : > { %s181_s28 = sshll.u32 %s173_s19, 4  ;;  %p82_p3 = scmp.eq.s32.totalorder %s79_s18, 0  ;;  %s883_s28 = int_to_ptr.vmem [resolvable:$true] %s181_s28 }
  0x35   : > { %s892_s27 = scalar_lea.sflag [#allocation3], %s169_s4  ;;  %s622_s6 = scalar_lea.hbm %s879_s30, 128 }
  0x36   : > { %s888_s26 = scalar_select %p82_p3, %s730_s14, %s84_s20  }
  0x37   : > { %p623_p7 = scmp.ne.s32.totalorder %s879_s30, %s622_s6  ;;  %p624_p8 = pneg %p841_p4 }
  0x38   : > { %s627_s9 = scalar_lea.hbm %s1070_s2, 256  ;;  %p628_p2 = scmp.lt.u32.totalorder %s879_s30, %s1070_s2 }
  0x39   : > { %p625_p9 = pnand %p624_p8, %p623_p7  ;;  %p629_p6 = scmp.lt.u32.totalorder %s627_s9, %s622_s6 }
  0x3a   : > { %p631_p0 = scmp.lt.u32.totalorder %s622_s6, %s879_s30 }
  0x3b   : > { %p626_p12 = pneg %p625_p9  ;;  %p630_p1 = por %p629_p6, %p628_p2 }
  0x3d   : > { %p632_p5 = por %p631_p0, %p630_p1 }
  0x3f   : > { %p633_p10 = pnand %p632_p5, %p626_p12 }
  0x41   : > { %636 = shalt.err (!%p633_p10)
}
  0x42   : > { %s637_s20 = scalar_lea.vmem %s883_s28, 128  ;;  %s746_s4 = smov [#allocation8]  }
  0x43   : > { %p638_p11 = scmp.ne.s32.totalorder %s883_s28, %s637_s20  ;;  %s642_s18 = sshll.u32 %s746_s4, 4  ;;  %s643_s18 = int_to_ptr.vmem [resolvable:$false] %s642_s18 }
  0x44   : > { %s644_s19 = scalar_lea.vmem %s643_s18, 256  ;;  %p645_p9 = scmp.lt.s32.totalorder %s883_s28, %s643_s18 }
  0x45   : > { %p640_p3 = pnand %p638_p11, %p624_p8  ;;  %p646_p2 = scmp.lt.s32.totalorder %s644_s19, %s637_s20 }
  0x47   : > { %p641_p7 = pneg %p640_p3  ;;  %p647_p6 = por %p646_p2, %p645_p9 }
  0x49   : > { %p648_p1 = pnand %p647_p6, %p641_p7 }
  0x4b   : > { %651 = shalt.err (!%p648_p1)
}
  0x4c   : > { %s747_s6 = smov 32   ;;  %s748_s7 = smov 2  }
  0x4d   : > { %529 = dma.hbm_to_vmem [thread:$0]  (!%p841_p4), %s879_s30, 128, %s883_s28, %s892_s27, %s747_s6, %s747_s6, %s748_s7  }
  0x4e   : > { %193 = sbr.rel (%p831_p13) target bundleno = 135 (0x87), region = 32  ;;  %p1083_p8 = scmp.ne.s32.totalorder (!%p831_p13), %s1076_s21, 0 }
  0x55   : > { %705 = dma.done.wait (%p1083_p8), [#allocation5], 64  }
  0x56   : > { %707 = vsyncadd (%p1083_p8), [#allocation5], 4294967232 }
  0x57   : > { %709 = dma.done.wait (%p1083_p8), [#allocation6], 16  }
  0x58   : > { %711 = vsyncadd (%p1083_p8), [#allocation6], 4294967280  ;;  %s931_s8 = sand.u32 1, %s726_s13   ;;  %p1084_p13 = scmp.ne.s32.totalorder %s1077_s22, 0 }
  0x59   : > { %s465_s25 = sshll.u32 %s931_s8, 3  ;;  %s204_s29 = scalar_lea.sflag [#allocation3], %s931_s8 }
  0x5a   : > { %s937_s30 = scalar_lea.vmem [#allocation8], %s465_s25 }
  0x5b   : > { %713 = dma.done.wait (%p1084_p13), %s204_s29, 128  }
  0x5c   : > { %715 = vsyncadd (%p1084_p13), %s204_s29, 4294967168 }
  0x5d   : > { %212 = sfence }
  0x5e   : > { %s232_s21 = sld [smem:[#allocation2]]  ;;  %s468_s27 = sld [smem:[#allocation2 + $0x1]]  ;;  %v231_v0 = vld [vmem:[%s937_s30] sm:$0x3]  ;;  %v467_v1 = vld [vmem:[%s937_s30 + $0x2] sm:$0x3] }
  0x5f   : > { %s235_s28 = sld [smem:[#allocation7]]  ;;  %s470_s9 = sld [smem:[#allocation2 + $0x2]]  ;;  %v469_v3 = vld [vmem:[%s937_s30 + $0x4] sm:$0x3]  ;;  %v471_v7 = vld [vmem:[%s937_s30 + $0x6] sm:$0x3] }
  0x60   : > { %s472_s10 = sld [smem:[#allocation2 + $0x3]]  ;;  %s944_s11 = sld [smem:[#allocation2 + $0x80]]  ;;  %v257_v10 = vld [vmem:[%s937_s30] sm:$0x3]  ;;  %v475_v14 = vld [vmem:[%s937_s30 + $0x2] sm:$0x3] }
  0x61   : > { %s947_s20 = sld [smem:[#allocation7 + $0x1]]  ;;  %s952_s22 = sld [smem:[#allocation2 + $0x82]]  ;;  %v477_v15 = vld [vmem:[%s937_s30 + $0x4] sm:$0x3]  ;;  %v479_v18 = vld [vmem:[%s937_s30 + $0x6] sm:$0x3] }
  0x62   : > { %s949_s4 = sld [smem:[#allocation2 + $0x81]]  ;;  %s954_s18 = sld [smem:[#allocation2 + $0x83]]  ;;  %v281_v26 = vld [vmem:[%s937_s30] sm:$0x3]  ;;  %v484_v27 = vld [vmem:[%s937_s30 + $0x2] sm:$0x3] }
  0x63   : > { %s957_s19 = sld [smem:[#allocation2 + $0x100]]  ;;  %s959_s6 = sld [smem:[#allocation7 + $0x2]]  ;;  %v486_v32 = vld [vmem:[%s937_s30 + $0x4] sm:$0x3]  ;;  %v305_v33 = vld [vmem:[%s937_s30] sm:$0x3] }
  0x64   : > { %v233_v2 = vstv %s232_s21  ;;  %v241_v6 = vstv %s468_s27  ;;  %s962_s7 = sld [smem:[#allocation2 + $0x101]]  ;;  %s964_s29 = sld [smem:[#allocation2 + $0x102]]  ;;  %v488_v42 = vld [vmem:[%s937_s30 + $0x6] sm:$0x3]  ;;  %v493_v46 = vld [vmem:[%s937_s30 + $0x2] sm:$0x3] }
  0x65   : > { %v234_v4 = vmul.f32 %v233_v2, %v231_v0  ;;  %v236_v5 = vstv %s235_s28  ;;  %v242_v8 = vmul.f32 %v467_v1, %v241_v6  ;;  %v247_v9 = vstv %s470_s9  ;;  %s968_s21 = sld [smem:[#allocation2 + $0x103]]  ;;  %s972_s28 = sld [smem:[#allocation2 + $0x180]]  ;;  %v495_v51 = vld [vmem:[%s937_s30 + $0x4] sm:$0x3]  ;;  %v497_v55 = vld [vmem:[%s937_s30 + $0x6] sm:$0x3] }
  0x66   : > { %v248_v12 = vmul.f32 %v469_v3, %v247_v9  ;;  %v253_v13 = vstv %s472_s10  ;;  %v259_v17 = vstv %s944_s11  ;;  %s974_s27 = sld [smem:[#allocation7 + $0x3]]  ;;  %s978_s9 = sld [smem:[#allocation2 + $0x181]] }
  0x67   : > { %v237_v11 = vadd.f32 %v236_v5, %v234_v4  ;;  %v254_v16 = vmul.f32 %v471_v7, %v253_v13  ;;  %v260_v20 = vmul.f32 %v259_v17, %v257_v10  ;;  %v262_v21 = vstv %s947_s20  ;;  %s980_s10 = sld [smem:[#allocation2 + $0x182]]  ;;  %s986_s11 = sld [smem:[#allocation2 + $0x183]] }
  0x68   : > { %v266_v22 = vstv %s949_s4  ;;  %v271_v24 = vstv %s952_s22  ;;  %v276_v25 = vstv %s954_s18  ;;  %s1001_s20 = scalar_lea.vmem [#allocation9], %s465_s25  ;;  %s506_s4 = sshll.u32 %s734_s15, 7 }
  0x69   : > { %v243_v19 = vadd.f32 %v242_v8, %v237_v11  ;;  %v267_v23 = vmul.f32 %v475_v14, %v266_v22  ;;  %v263_v29 = vadd.f32 %v262_v21, %v260_v20  ;;  %v272_v30 = vmul.f32 %v477_v15, %v271_v24  ;;  %s344_s25 = sshll.u32 %s1001_s20, 4  ;;  %s1018_s18 = scalar_lea.hbm %s1071_s3, %s506_s4  ;;  %s1012_s25 = int_to_ptr.vmem [resolvable:$true] %s344_s25 }
  0x6a   : > { %v277_v31 = vmul.f32 %v479_v18, %v276_v25  ;;  %v283_v34 = vstv %s957_s19  ;;  %v286_v35 = vstv %s959_s6  ;;  %v290_v36 = vstv %s962_s7  ;;  %s330_s19 = scalar_lea.sflag [#allocation4], %s931_s8  ;;  %s652_s6 = scalar_lea.vmem %s1012_s25, 128 }
  0x6b   : > { %v249_v28 = vadd.f32 %v248_v12, %v243_v19  ;;  %v295_v37 = vstv %s964_s29  ;;  %v268_v39 = vadd.f32 %v267_v23, %v263_v29  ;;  %v284_v40 = vmul.f32 %v283_v34, %v281_v26  ;;  %p653_p4 = scmp.ne.s32.totalorder %s1012_s25, %s652_s6  ;;  %p1085_p12 = scmp.ne.s32.totalorder %s1078_s23, 0 }
  0x6c   : > { %v291_v41 = vmul.f32 %v484_v27, %v290_v36  ;;  %v300_v43 = vstv %s968_s21  ;;  %v307_v44 = vstv %s972_s28  ;;  %v310_v45 = vstv %s974_s27  ;;  %s749_s15 = smov [#allocation9]  }
  0x6d   : > { %v255_v38 = vadd.f32 %v254_v16, %v249_v28  ;;  %v273_v47 = vadd.f32 %v272_v30, %v268_v39  ;;  %v287_v48 = vadd.f32 %v286_v35, %v284_v40  ;;  %v296_v49 = vmul.f32 %v486_v32, %v295_v37  ;;  %p654_p0 = pnand %p653_p4, %p1085_p12  ;;  %s656_s7 = sshll.u32 %s749_s15, 4  ;;  %s657_s7 = int_to_ptr.vmem [resolvable:$false] %s656_s7 }
  0x6e   : > { %v308_v50 = vmul.f32 %v307_v44, %v305_v33  ;;  %v301_v52 = vmul.f32 %v488_v42, %v300_v43  ;;  %v314_v53 = vstv %s978_s9  ;;  %v319_v54 = vstv %s980_s10  ;;  %s658_s29 = scalar_lea.vmem %s657_s7, 256  ;;  %p659_p10 = scmp.lt.s32.totalorder %s1012_s25, %s657_s7 }
  0x6f   : > { %256 = vst [vmem:[%s1001_s20] sm:$0x3] %v255_v38  ;;  %v324_v56 = vstv %s986_s11  ;;  %v278_v57 = vadd.f32 %v277_v31, %v273_v47  ;;  %v292_v58 = vadd.f32 %v291_v41, %v287_v48  ;;  %v315_v60 = vmul.f32 %v493_v46, %v314_v53  ;;  %p655_p5 = pneg %p654_p0  ;;  %p660_p11 = scmp.lt.s32.totalorder %s658_s29, %s652_s6 }
  0x70   : > { %v311_v59 = vadd.f32 %v310_v45, %v308_v50  ;;  %v320_v61 = vmul.f32 %v495_v51, %v319_v54  ;;  %v325_v0 = vmul.f32 %v497_v55, %v324_v56 }
  0x71   : > { %481 = vst [vmem:[%s1001_s20 + $0x2] sm:$0x3] %v278_v57  ;;  %v297_v62 = vadd.f32 %v296_v49, %v292_v58  ;;  %p661_p3 = por %p660_p11, %p659_p10 }
  0x72   : > { %v316_v63 = vadd.f32 %v315_v60, %v311_v59 }
  0x73   : > { %v302_v1 = vadd.f32 %v301_v52, %v297_v62  ;;  %p662_p7 = pnand %p661_p3, %p655_p5 }
  0x74   : > { %v321_v2 = vadd.f32 %v320_v61, %v316_v63 }
  0x75   : > { %490 = vst [vmem:[%s1001_s20 + $0x4] sm:$0x3] %v302_v1 }
  0x76   : > { %v326_v3 = vadd.f32 %v325_v0, %v321_v2 }
  0x78   : > { %499 = vst [vmem:[%s1001_s20 + $0x6] sm:$0x3] %v326_v3 }
  0x79   : > { %665 = shalt.err (!%p662_p7)
}
  0x7a   : > { %s666_s21 = scalar_lea.hbm %s1018_s18, 128  ;;  %s670_s9 = scalar_lea.hbm %s1071_s3, 256 }
  0x7b   : > { %p667_p9 = scmp.ne.s32.totalorder %s1018_s18, %s666_s21  ;;  %p671_p1 = scmp.lt.u32.totalorder %s1018_s18, %s1071_s3 }
  0x7c   : > { %p672_p8 = scmp.lt.u32.totalorder %s670_s9, %s666_s21  ;;  %p674_p4 = scmp.lt.u32.totalorder %s666_s21, %s1018_s18 }
  0x7d   : > { %p668_p2 = pnand %p667_p9, %p1085_p12 }
  0x7e   : > { %p673_p13 = por %p672_p8, %p671_p1 }
  0x7f   : > { %p669_p6 = pneg %p668_p2 }
  0x80   : > { %p675_p0 = por %p674_p4, %p673_p13 }
  0x82   : > { %p676_p5 = pnand %p675_p0, %p669_p6 }
  0x84   : > { %679 = shalt.err (!%p676_p5)
}
  0x85   : > { %s750_s20 = smov 32   ;;  %s751_s4 = smov 2  }
  0x86   : > { %517 = dma.vmem_to_hbm [thread:$0]  (%p1085_p12), %s1012_s25, 128, %s1018_s18, %s330_s19, %s750_s20, %s750_s20, %s751_s4  }
  0x87 PF: > { %s359_s30 = sand.u32 1, %s722_s12   ;;  %p1086_p10 = scmp.ne.s32.totalorder %s1079_s24, 0 }
  0x88   : > { %p1087_p11 = scmp.ge.s32.totalorder %s742_s17, 2  ;;  %s360_s22 = scalar_lea.sflag [#allocation4], %s359_s30 }
  0x8a   : > { %p531_p3 = pnand %p1087_p11, %p1086_p10 }
  0x8c   : > { %717 = dma.done.wait (!%p531_p3), %s360_s22, 128  }
  0x8d   : > { %719 = vsyncadd (!%p531_p3), %s360_s22, 4294967168  ;;  %s21_s17 = sadd.s32 1, %s742_s17   ;;  %s1088_s12 = smov %s726_s13 }
  0x8e   : > { %p18_p7 = scmp.ge.s32.totalorder %s21_s17, 4   ;;  %s1089_s13 = smov %s730_s14 }
  0x8f   : > { %s1090_s14 = smov %s888_s26  ;;  %s1091_s15 = smov %s738_s16 }
  0x90   : > { %s1092_s16 = smov %s1094_s5  ;;  %20 = sbr.rel (!%p18_p7) target bundleno = 8 (0x8), region = 93 }
  0x97   :  { %365 = vsyncpa [#allocation3], 1 }
  0x98   :  { %367 = vsyncpa [#allocation3 + $0x1], 1 }
  0x99   :  { %368 = vsyncpa [#allocation4], 1 }
  0x9a   :  { %370 = vsyncpa [#allocation4 + $0x1], 1 }
  0x9b   :  { %371 = vsyncpa [#allocation5], 1 }
  0x9c   :  { %373 = vsyncpa [#allocation5 + $0x1], 1 }
  0x9d   :  { %374 = vsyncpa [#allocation6], 1 }
  0x9e   :  { %376 = vsyncpa [#allocation6 + $0x1], 1 }

</bundles_post_ra>
